<compile_context>
chip_gen: v6e
topology: v6e:2x2x1
jax: 0.10.0
libtpu: 0.0.40
codegen_flags: <defaults>
</compile_context>

<pallas_src>
import jax
import jax.numpy as jnp
from jax import lax
from jax.experimental import pallas as pl
from jax.experimental.pallas import tpu as pltpu


def _round_up(x, m):
    return (x + m - 1) // m * m


def _embedding_kernel(widx_ref,     # SMEM scalar prefetch: (Npad,) int32 word row ids
                      pos_ref,      # (TT, 2) int32: fused-pos-vocab ids (pos1, pos2)
                      word_hbm,     # (Vw, Dpad) word table, HBM resident (ANY)
                      pos_tab_ref,  # (Vpos_pad, Dpad) fused block-diag pos table (VMEM)
                      out_ref,      # (TT, Dpad) output tile (lane dense)
                      word_buf,     # (2, TT, Dpad) VMEM scratch: gathered word rows
                      sem):         # DMA semaphores, shape (2,) — one per buffer slot
    TT, Dpad = out_ref.shape
    tile = pl.program_id(0)
    ntiles = pl.num_programs(0)

    def issue_gather(tile_idx, slot):
        base = tile_idx * TT

        def body(i, carry):
            row = widx_ref[base + i]                       # SMEM scalar read
            pltpu.make_async_copy(
                word_hbm.at[row],                          # (Dpad,) HBM row
                word_buf.at[slot, i],                      # (Dpad,) VMEM row
                sem.at[slot],
            ).start()
            return carry

        lax.fori_loop(0, TT, body, 0)

    def wait_gather(slot):
        def body(i, carry):
            # wait() only needs a descriptor of matching size/semaphore.
            pltpu.make_async_copy(
                word_hbm.at[0], word_buf.at[slot, 0], sem.at[slot]
            ).wait()
            return carry

        lax.fori_loop(0, TT, body, 0)

    # Prime the pipeline: fetch tile 0 into slot 0 on the first grid step.
    @pl.when(tile == 0)
    def _():
        issue_gather(0, 0)

    # Prefetch the NEXT tile's word rows into the other slot (double buffer),
    # issued before waiting on the current tile so the DMAs overlap compute.
    @pl.when(tile + 1 < ntiles)
    def _():
        issue_gather(tile + 1, (tile + 1) % 2)

    slot = tile % 2
    wait_gather(slot)

    # --- tiny pos one-hot matmul over the fused (padded-to-128) pos vocab ---
    v_pos = pos_tab_ref.shape[0]
    iota = lax.broadcasted_iota(jnp.int32, (TT, v_pos), 1)        # (TT, Vpos_pad)
    p1 = pos_ref[:, 0:1]
    p2 = pos_ref[:, 1:2]
    onehot = ((iota == p1) | (iota == p2)).astype(pos_tab_ref.dtype)
    pos_vals = jnp.dot(onehot, pos_tab_ref[...],
                       preferred_element_type=jnp.float32)        # (TT, Dpad)

    # Word columns come from the gather (zeros elsewhere); pos columns come
    # from the matmul (zeros elsewhere) -> sum == concatenation, lane dense.
    out_ref[...] = (word_buf[slot] + pos_vals).astype(out_ref.dtype)


def prepare_embedding_params(w_tab, p1_tab, p2_tab):
    """One-time parameter prep (hoisted out of the forward pass)."""
    Vw, Dw = w_tab.shape
    Vp1, Dp = p1_tab.shape
    Vp2, Dp2 = p2_tab.shape
    assert Dp == Dp2, "pos1/pos2 embedding dims must match"
    Dtot = Dw + 2 * Dp
    Dpad = _round_up(Dtot, 128)          # lane-dense output / row width
    Vpos = Vp1 + Vp2
    Vpos_pad = _round_up(Vpos, 128)      # lane-dense one-hot compares, clean MXU K

    # Word table stays in HBM; rows padded to the full output width so a
    # gathered row can simply be added to the pos matmul result.
    w_hbm = jnp.zeros((Vw, Dpad), w_tab.dtype).at[:, :Dw].set(w_tab)

    # Fused block-diagonal pos table (tiny; VMEM resident in the kernel):
    #   rows [0,Vp1)       x cols [Dw, Dw+Dp)    = pos1 table
    #   rows [Vp1,Vp1+Vp2) x cols [Dw+Dp, Dtot)  = pos2 table
    pos_tab = jnp.zeros((Vpos_pad, Dpad), p1_tab.dtype)
    pos_tab = pos_tab.at[:Vp1, Dw:Dw + Dp].set(p1_tab)
    pos_tab = pos_tab.at[Vp1:Vpos, Dw + Dp:Dtot].set(p2_tab)

    meta = dict(Vw=Vw, Dw=Dw, Dp=Dp, Vp1=Vp1, Vp2=Vp2,
                Dtot=Dtot, Dpad=Dpad, Vpos_pad=Vpos_pad)
    return w_hbm, pos_tab, meta


def embedding_forward(input_word, input_pos1, input_pos2,
                      w_hbm, pos_tab, meta, *, token_tile=128):
    """token_tile: 128 is a good default; 256 amortizes per-step overhead on
    v6e/v7x (VMEM use here is tiny either way since no big table is resident)."""
    B, S = input_word.shape
    Vw, Vp1, Vp2 = meta["Vw"], meta["Vp1"], meta["Vp2"]
    Dtot, Dpad, Vpos_pad = meta["Dtot"], meta["Dpad"], meta["Vpos_pad"]
    TT = token_tile
    assert TT % 8 == 0

    Ntok = B * S
    Npad = _round_up(Ntok, TT)

    # Word row ids -> SMEM scalar prefetch (drives the HBM row-gather DMAs).
    iw = jnp.clip(input_word.reshape(-1).astype(jnp.int32), 0, Vw - 1)
    iw = jnp.pad(iw, (0, Npad - Ntok))

    # pos1/pos2 ids packed into ONE (Npad, 2) stream, pre-offset into the fused
    # pos vocab (pos2 rows sit after pos1 rows); clamped to their own ranges.
    p1 = jnp.clip(input_pos1.reshape(-1).astype(jnp.int32), 0, Vp1 - 1)
    p2 = jnp.clip(input_pos2.reshape(-1).astype(jnp.int32), 0, Vp2 - 1) + Vp1
    pos_idx = jnp.pad(jnp.stack([p1, p2], axis=-1), ((0, Npad - Ntok), (0, 0)))

    grid = (Npad // TT,)

    # VMEM actually used (double-buffered word scratch + pipeline buffers +
    # resident pos table + temps), with 2x slack; capped generation-safe.
    est = 4 * (2 * TT * Dpad            # word-row double buffer
               + 2 * TT * Dpad          # output tile double buffer
               + 2 * TT * 128           # packed pos-id tiles (lane padded)
               + 2 * Vpos_pad * Dpad    # pos table (pipeline double buffer)
               + 2 * TT * Vpos_pad)     # one-hot / matmul temporaries
    vmem_limit = int(min(max(2 * est, 16 * 1024 * 1024), 48 * 1024 * 1024))

    out = pl.pallas_call(
        _embedding_kernel,
        out_shape=jax.ShapeDtypeStruct((Npad, Dpad), w_hbm.dtype),
        grid_spec=pltpu.PrefetchScalarGridSpec(
            num_scalar_prefetch=1,
            grid=grid,
            in_specs=[
                pl.BlockSpec((TT, 2), lambda t, widx: (t, 0)),           # packed pos ids
                pl.BlockSpec(memory_space=pl.ANY),                       # word table, HBM
                pl.BlockSpec((Vpos_pad, Dpad), lambda t, widx: (0, 0)),  # pos table, VMEM
            ],
            out_specs=pl.BlockSpec((TT, Dpad), lambda t, widx: (t, 0)),
            scratch_shapes=[
                pltpu.VMEM((2, TT, Dpad), w_hbm.dtype),   # gathered-row double buffer
                pltpu.SemaphoreType.DMA((2,)),            # one DMA sem per slot
            ],
        ),
        compiler_params=pltpu.CompilerParams(
            # Word-row prefetch is carried across grid steps in scratch, so the
            # grid axis must execute sequentially ("arbitrary", not "parallel").
            dimension_semantics=("arbitrary",),
            vmem_limit_bytes=vmem_limit,
        ),
    )(iw, pos_idx, w_hbm, pos_tab)

    return out[:Ntok, :Dtot].reshape(B, S, Dtot)


def make_params(key, vocabulary_size, word_vec_size, position_num, position_size):
    """Deterministic parameter init mirroring Embedding.__init__/init_embeddings."""
    k_w, k_p1, k_p2 = jax.random.split(key, 3)

    # "pretrained_word_embedding" copied into nn.Embedding(vocab+2, word_vec_size)
    w_tab = jax.random.normal(k_w, (vocabulary_size + 2, word_vec_size), jnp.float32)

    # xavier_uniform_ on (position_num + 1, position_size), then zero padding row
    def xavier_uniform(k, shape):
        fan_out, fan_in = shape
        bound = (6.0 / (fan_in + fan_out)) ** 0.5
        return jax.random.uniform(k, shape, jnp.float32, -bound, bound)

    padding_idx = position_num
    p1_tab = xavier_uniform(k_p1, (position_num + 1, position_size))
    p1_tab = p1_tab.at[padding_idx].set(0.0)
    p2_tab = xavier_uniform(k_p2, (position_num + 1, position_size))
    p2_tab = p2_tab.at[padding_idx].set(0.0)
    return w_tab, p1_tab, p2_tab


if __name__ == "__main__":
    # opt-equivalent small config
    vocabulary_size = 30     # word table rows = 32
    word_vec_size = 32
    position_num = 15        # pos table rows = 16, padding_idx = 15
    position_size = 8
    B, S = 2, 8

    key = jax.random.PRNGKey(0)
    k_params, k_w, k_p1, k_p2 = jax.random.split(key, 4)

    w_tab, p1_tab, p2_tab = make_params(
        k_params, vocabulary_size, word_vec_size, position_num, position_size)

    input_word = jax.random.randint(k_w, (B, S), 0, vocabulary_size + 2, jnp.int32)
    input_pos1 = jax.random.randint(k_p1, (B, S), 0, position_num + 1, jnp.int32)
    input_pos2 = jax.random.randint(k_p2, (B, S), 0, position_num + 1, jnp.int32)

    # one-time parameter prep (hoisted out of the forward pass)
    w_hbm, pos_tab, meta = prepare_embedding_params(w_tab, p1_tab, p2_tab)

    # pure-JAX reference (plain gathers + concat)
    ref = jnp.concatenate(
        [w_tab[input_word], p1_tab[input_pos1], p2_tab[input_pos2]], axis=2)

    # Small token tile -> 2 grid steps: exercises prologue + cross-step
    # double-buffered word-row prefetch.
    out_small = embedding_forward(input_word, input_pos1, input_pos2,
                                  w_hbm, pos_tab, meta, token_tile=8)
    out_small = jax.block_until_ready(out_small)
    assert out_small.shape == (B, S, word_vec_size + 2 * position_size), out_small.shape
    assert jnp.allclose(out_small, ref, atol=1e-6), "mismatch vs reference (tile=8)"

    # Default production tile (single grid step at this toy size).
    out = embedding_forward(input_word, input_pos1, input_pos2, w_hbm, pos_tab, meta)
    out = jax.block_until_ready(out)
    assert jnp.allclose(out, ref, atol=1e-6), "mismatch vs reference (tile=128)"

    print("KERNEL_OK")
</pallas_src>

<mosaic_0001>
module attributes {stable_mosaic.version = 11 : i64} {
  func.func @_embedding_kernel(%arg0: i32, %arg1: memref<16xi32, #tpu.memory_space<smem>>, %arg2: memref<8x2xi32, #tpu.memory_space<vmem>>, %arg3: memref<32x128xf32, #tpu.memory_space<any>>, %arg4: memref<128x128xf32, #tpu.memory_space<vmem>>, %arg5: memref<8x128xf32, #tpu.memory_space<vmem>>, %arg6: memref<2x8x128xf32, #tpu.memory_space<vmem>>, %arg7: memref<2x!tpu.dma_semaphore, #tpu.memory_space<semaphore_mem>>) attributes {dimension_semantics = [#tpu.dimension_semantics<arbitrary>], iteration_bounds = array<i64: 2>, scalar_prefetch = 1 : i64, scratch_operands = 2 : i64, tpu.core_type = #tpu.core_type<tc>, window_params = [{transform_indices = @transform_0, window_bounds = array<i64: 8, 2>}, {}, {pipeline_mode = #tpu.pipeline_mode<synchronous>, transform_indices = @transform_2, window_bounds = array<i64: 128, 128>}, {transform_indices = @transform_3, window_bounds = array<i64: 8, 128>}]} {
    %c0_i32 = arith.constant 0 : i32
    %0 = arith.cmpi eq, %arg0, %c0_i32 : i32
    %1 = arith.extui %0 : i1 to i32
    %c0_i32_0 = arith.constant 0 : i32
    %2 = arith.cmpi ne, %1, %c0_i32_0 : i32
    scf.if %2 {
      %c0_i32_18 = arith.constant 0 : i32
      %c8_i32_19 = arith.constant 8 : i32
      %35 = arith.addi %c0_i32_18, %c8_i32_19 : i32
      %c1_i32_20 = arith.constant 1 : i32
      scf.for %arg8 = %c0_i32_18 to %35 step %c1_i32_20  : i32 {
        %c0_i32_22 = arith.constant 0 : i32
        %36 = arith.addi %c0_i32_22, %arg8 : i32
        %37 = arith.index_cast %36 : i32 to index
        %38 = memref.load %arg1[%37] : memref<16xi32, #tpu.memory_space<smem>>
        %c0_i32_23 = arith.constant 0 : i32
        %c0_i32_24 = arith.constant 0 : i32
        %c0_i32_25 = arith.constant 0 : i32
        %39 = tpu.memref_slice %arg3[%38, %c0_i32_25] : memref<32x128xf32, #tpu.memory_space<any>> -> memref<1x128xf32, #tpu.memory_space<any>>
        %40 = tpu.memref_squeeze %39 : memref<1x128xf32, #tpu.memory_space<any>> -> memref<128xf32, #tpu.memory_space<any>>
        %c0_i32_26 = arith.constant 0 : i32
        %41 = tpu.memref_slice %arg6[%c0_i32_23, %arg8, %c0_i32_26] : memref<2x8x128xf32, #tpu.memory_space<vmem>> -> memref<1x1x128xf32, #tpu.memory_space<vmem>>
        %42 = tpu.memref_squeeze %41 : memref<1x1x128xf32, #tpu.memory_space<vmem>> -> memref<128xf32, #tpu.memory_space<vmem>>
        %43 = tpu.memref_slice %arg7[%c0_i32_24] : memref<2x!tpu.dma_semaphore, #tpu.memory_space<semaphore_mem>> -> memref<1x!tpu.dma_semaphore, #tpu.memory_space<semaphore_mem>>
        %44 = tpu.memref_squeeze %43 : memref<1x!tpu.dma_semaphore, #tpu.memory_space<semaphore_mem>> -> memref<!tpu.dma_semaphore, #tpu.memory_space<semaphore_mem>>
        tpu.enqueue_dma source(%40 : memref<128xf32, #tpu.memory_space<any>>) target(%42 : memref<128xf32, #tpu.memory_space<vmem>>) target_semaphore(%44 : memref<!tpu.dma_semaphore, #tpu.memory_space<semaphore_mem>>)
      }
      %c8_i32_21 = arith.constant 8 : i32
    } else {
    }
    %c1_i32 = arith.constant 1 : i32
    %3 = arith.addi %arg0, %c1_i32 : i32
    %c2_i32 = arith.constant 2 : i32
    %4 = arith.cmpi slt, %3, %c2_i32 : i32
    %5 = arith.extui %4 : i1 to i32
    %c0_i32_1 = arith.constant 0 : i32
    %6 = arith.cmpi ne, %5, %c0_i32_1 : i32
    scf.if %6 {
      %c1_i32_18 = arith.constant 1 : i32
      %35 = arith.addi %arg0, %c1_i32_18 : i32
      %c1_i32_19 = arith.constant 1 : i32
      %36 = arith.addi %arg0, %c1_i32_19 : i32
      %c2_i32_20 = arith.constant 2 : i32
      %c0_i32_21 = arith.constant 0 : i32
      %37 = arith.cmpi eq, %c2_i32_20, %c0_i32_21 : i32
      %c1_i32_22 = arith.constant 1 : i32
      %38 = arith.select %37, %c1_i32_22, %c2_i32_20 : i32
      %39 = arith.remsi %36, %38 : i32
      %c0_i32_23 = arith.constant 0 : i32
      %40 = arith.cmpi ne, %39, %c0_i32_23 : i32
      %c0_i32_24 = arith.constant 0 : i32
      %41 = arith.cmpi slt, %39, %c0_i32_24 : i32
      %c0_i32_25 = arith.constant 0 : i32
      %42 = arith.cmpi slt, %38, %c0_i32_25 : i32
      %43 = arith.xori %41, %42 : i1
      %44 = arith.andi %43, %40 : i1
      %45 = arith.addi %39, %38 : i32
      %46 = arith.select %44, %45, %39 : i32
      %c8_i32_26 = arith.constant 8 : i32
      %47 = arith.muli %35, %c8_i32_26 : i32
      %c0_i32_27 = arith.constant 0 : i32
      %c8_i32_28 = arith.constant 8 : i32
      %48 = arith.addi %c0_i32_27, %c8_i32_28 : i32
      %c1_i32_29 = arith.constant 1 : i32
      scf.for %arg8 = %c0_i32_27 to %48 step %c1_i32_29  : i32 {
        %49 = arith.addi %47, %arg8 : i32
        %50 = arith.index_cast %49 : i32 to index
        %51 = memref.load %arg1[%50] : memref<16xi32, #tpu.memory_space<smem>>
        %c0_i32_31 = arith.constant 0 : i32
        %52 = tpu.memref_slice %arg3[%51, %c0_i32_31] : memref<32x128xf32, #tpu.memory_space<any>> -> memref<1x128xf32, #tpu.memory_space<any>>
        %53 = tpu.memref_squeeze %52 : memref<1x128xf32, #tpu.memory_space<any>> -> memref<128xf32, #tpu.memory_space<any>>
        %c0_i32_32 = arith.constant 0 : i32
        %54 = tpu.memref_slice %arg6[%46, %arg8, %c0_i32_32] : memref<2x8x128xf32, #tpu.memory_space<vmem>> -> memref<1x1x128xf32, #tpu.memory_space<vmem>>
        %55 = tpu.memref_squeeze %54 : memref<1x1x128xf32, #tpu.memory_space<vmem>> -> memref<128xf32, #tpu.memory_space<vmem>>
        %56 = tpu.memref_slice %arg7[%46] : memref<2x!tpu.dma_semaphore, #tpu.memory_space<semaphore_mem>> -> memref<1x!tpu.dma_semaphore, #tpu.memory_space<semaphore_mem>>
        %57 = tpu.memref_squeeze %56 : memref<1x!tpu.dma_semaphore, #tpu.memory_space<semaphore_mem>> -> memref<!tpu.dma_semaphore, #tpu.memory_space<semaphore_mem>>
        tpu.enqueue_dma source(%53 : memref<128xf32, #tpu.memory_space<any>>) target(%55 : memref<128xf32, #tpu.memory_space<vmem>>) target_semaphore(%57 : memref<!tpu.dma_semaphore, #tpu.memory_space<semaphore_mem>>)
      }
      %c8_i32_30 = arith.constant 8 : i32
    } else {
    }
    %c2_i32_2 = arith.constant 2 : i32
    %c0_i32_3 = arith.constant 0 : i32
    %7 = arith.cmpi eq, %c2_i32_2, %c0_i32_3 : i32
    %c1_i32_4 = arith.constant 1 : i32
    %8 = arith.select %7, %c1_i32_4, %c2_i32_2 : i32
    %9 = arith.remsi %arg0, %8 : i32
    %c0_i32_5 = arith.constant 0 : i32
    %10 = arith.cmpi ne, %9, %c0_i32_5 : i32
    %c0_i32_6 = arith.constant 0 : i32
    %11 = arith.cmpi slt, %9, %c0_i32_6 : i32
    %c0_i32_7 = arith.constant 0 : i32
    %12 = arith.cmpi slt, %8, %c0_i32_7 : i32
    %13 = arith.xori %11, %12 : i1
    %14 = arith.andi %13, %10 : i1
    %15 = arith.addi %9, %8 : i32
    %16 = arith.select %14, %15, %9 : i32
    %c0_i32_8 = arith.constant 0 : i32
    %c8_i32 = arith.constant 8 : i32
    %17 = arith.addi %c0_i32_8, %c8_i32 : i32
    %c1_i32_9 = arith.constant 1 : i32
    scf.for %arg8 = %c0_i32_8 to %17 step %c1_i32_9  : i32 {
      %c0_i32_18 = arith.constant 0 : i32
      %c0_i32_19 = arith.constant 0 : i32
      %c0_i32_20 = arith.constant 0 : i32
      %35 = tpu.memref_slice %arg3[%c0_i32_18, %c0_i32_20] : memref<32x128xf32, #tpu.memory_space<any>> -> memref<1x128xf32, #tpu.memory_space<any>>
      %36 = tpu.memref_squeeze %35 : memref<1x128xf32, #tpu.memory_space<any>> -> memref<128xf32, #tpu.memory_space<any>>
      %c0_i32_21 = arith.constant 0 : i32
      %37 = tpu.memref_slice %arg6[%16, %c0_i32_19, %c0_i32_21] : memref<2x8x128xf32, #tpu.memory_space<vmem>> -> memref<1x1x128xf32, #tpu.memory_space<vmem>>
      %38 = tpu.memref_squeeze %37 : memref<1x1x128xf32, #tpu.memory_space<vmem>> -> memref<128xf32, #tpu.memory_space<vmem>>
      %39 = tpu.memref_slice %arg7[%16] : memref<2x!tpu.dma_semaphore, #tpu.memory_space<semaphore_mem>> -> memref<1x!tpu.dma_semaphore, #tpu.memory_space<semaphore_mem>>
      %40 = tpu.memref_squeeze %39 : memref<1x!tpu.dma_semaphore, #tpu.memory_space<semaphore_mem>> -> memref<!tpu.dma_semaphore, #tpu.memory_space<semaphore_mem>>
      tpu.wait_dma2 semaphore(%40 : memref<!tpu.dma_semaphore, #tpu.memory_space<semaphore_mem>>) src(%36 : memref<128xf32, #tpu.memory_space<any>>) dst(%38 : memref<128xf32, #tpu.memory_space<vmem>>)
    }
    %18 = tpu.iota {dimensions = array<i32: 1>} : vector<8x128xi32>
    %c0 = arith.constant 0 : index
    %c0_10 = arith.constant 0 : index
    %19 = vector.load %arg2[%c0, %c0_10] : memref<8x2xi32, #tpu.memory_space<vmem>>, vector<8x1xi32>
    %c0_11 = arith.constant 0 : index
    %c1 = arith.constant 1 : index
    %20 = vector.load %arg2[%c0_11, %c1] : memref<8x2xi32, #tpu.memory_space<vmem>>, vector<8x1xi32>
    %21 = vector.broadcast %19 : vector<8x1xi32> to vector<8x128xi32>
    %22 = arith.cmpi eq, %18, %21 : vector<8x128xi32>
    %23 = vector.broadcast %20 : vector<8x1xi32> to vector<8x128xi32>
    %24 = arith.cmpi eq, %18, %23 : vector<8x128xi32>
    %25 = arith.ori %22, %24 : vector<8x128xi1>
    %26 = arith.extui %25 : vector<8x128xi1> to vector<8x128xi32>
    %27 = arith.sitofp %26 : vector<8x128xi32> to vector<8x128xf32>
    %c0_12 = arith.constant 0 : index
    %c0_13 = arith.constant 0 : index
    %28 = vector.load %arg4[%c0_12, %c0_13] : memref<128x128xf32, #tpu.memory_space<vmem>>, vector<128x128xf32>
    %cst = arith.constant dense<0.000000e+00> : vector<8x128xf32>
    %29 = tpu.matmul %27, %28, %cst {dimension_numbers = #tpu.dot_dimension_numbers<[1], [0], [0], [1], [0, 0, 1, 1], [], []>} : vector<8x128xf32>, vector<128x128xf32>, vector<8x128xf32> -> vector<8x128xf32>
    %30 = arith.index_cast %16 : i32 to index
    %c0_14 = arith.constant 0 : index
    %c0_15 = arith.constant 0 : index
    %31 = vector.load %arg6[%30, %c0_14, %c0_15] : memref<2x8x128xf32, #tpu.memory_space<vmem>>, vector<1x8x128xf32>
    %32 = vector.shape_cast %31 : vector<1x8x128xf32> to vector<8x128xf32>
    %33 = arith.addf %32, %29 : vector<8x128xf32>
    %c0_16 = arith.constant 0 : index
    %c0_17 = arith.constant 0 : index
    %34 = vector.load %arg5[%c0_16, %c0_17] : memref<8x128xf32, #tpu.memory_space<vmem>>, vector<8x128xf32>
    tpu.vector_store %arg5[%c0_16, %c0_17], %33 {strides = array<i32>} : memref<8x128xf32, #tpu.memory_space<vmem>>, vector<8x128xf32>,
    return
  }
  func.func @transform_0(%arg0: i32, %arg1: memref<16xi32, #tpu.memory_space<smem>>) -> (i32, i32) {
    %c0_i32 = arith.constant 0 : i32
    %c0_i32_0 = arith.constant 0 : i32
    return %arg0, %c0_i32 : i32, i32
  }
  func.func @transform_2(%arg0: i32, %arg1: memref<16xi32, #tpu.memory_space<smem>>) -> (i32, i32) {
    %c0_i32 = arith.constant 0 : i32
    %c0_i32_0 = arith.constant 0 : i32
    %c0_i32_1 = arith.constant 0 : i32
    return %c0_i32, %c0_i32_0 : i32, i32
  }
  func.func @transform_3(%arg0: i32, %arg1: memref<16xi32, #tpu.memory_space<smem>>) -> (i32, i32) {
    %c0_i32 = arith.constant 0 : i32
    %c0_i32_0 = arith.constant 0 : i32
    return %arg0, %c0_i32 : i32, i32
  }
}

</mosaic_0001>

<bundles_post_ra>
// kernel: tpu_custom_call.1
= control target key start
LH: loop header
LB: loop body
LE: loop exit
PB: predicated region body
PF: predicated region fallthrough
CT: control target
= control target key end

     0   :  { %s1046_s0 = inlined_call_operand.vmem [shape: s32[16], index: 0, kind: input, shape index: {}]   ;;  %s1047_s1 = inlined_call_operand.vmem [shape: s32[16,2], index: 1, kind: input, shape index: {}]   ;;  %s1048_s2 = inlined_call_operand.hbm [shape: f32[32,128], index: 2, kind: input, shape index: {}]   ;;  %s1049_s3 = inlined_call_operand.hbm [shape: f32[128,128], index: 3, kind: input, shape index: {}]   ;;  %s1050_s4 = inlined_call_operand.hbm [shape: f32[16,128], index: 4, kind: output, shape index: {}]  }
   0x1   :  { %1053 = sst [smem:[#allocation22_spill]] %s1047_s1  ;;  %s9_s17 = sshll.u32 %s1046_s0, 4  ;;  %s10_s17 = int_to_ptr.vmem [resolvable:$true] %s9_s17 }
   0x2   :  { %1054 = sst [smem:[#allocation23_spill]] %s1049_s3  ;;  %s648_s18 = scalar_lea.vmem %s10_s17, 16 }
   0x3   :  { %p649_p0 = scmp.ne.s32.totalorder %s10_s17, %s648_s18  ;;  %p653_p1 = scmp.lt.s32.totalorder %s10_s17, %s10_s17 }
   0x4   :  { %p654_p2 = scmp.lt.s32.totalorder %s648_s18, %s648_s18 }
   0x6   :  { %p655_p3 = por %p654_p2, %p653_p1 }
   0x8   :  { %p656_p4 = pnand %p655_p3, %p649_p0 }
   0xa   :  { %659 = shalt.err (!%p656_p4)  }
   0xb   :  { %s824_s19 = smov [#allocation5]  }
   0xc   :  { %12 = dma.vmem_to_smem %s10_s17, 16, %s824_s19, [#allocation4] }
   0xd   :  { %784 = dma.done.wait [#allocation4], 16 }
   0xe   :  { %785 = vsyncadd [#allocation4], 4294967280 }
   0xf   :  { %14 = sfence }
  0x10   :  { %15 = vsyncpa [#allocation7], 0 }
  0x11   :  { %16 = vsyncpa [#allocation8], 0 }
  0x12   :  { %18 = vsyncpa [#allocation8 + $0x1], 0  ;;  %s864_s20 = smov 0   ;;  %s866_s21 = smov 0  }
  0x13   :  { %s868_s0 = smov 0   ;;  %s870_s22 = smov 0  }
  0x14 LB: > { %1055 = sst [smem:[#allocation20_spill]] %s806_s0  ;;  %s885_s23 = sadd.s32 4294967295, %s810_s22   ;;  %s810_s22 = sphi %s870_s22, %s1071_s22   ;;  %s806_s0 = sphi %s868_s0, %s1068_s0   ;;  %s802_s21 = sphi %s866_s21, %s1070_s21   ;;  %s798_s20 = sphi %s864_s20, %s1069_s20  }
  0x15   : > { %s481_s24 = sadd.s32 4294967294, %s810_s22   ;;  %s889_s25 = sadd.s32 1, %s810_s22  }
  0x16   : > { %s78_s26 = sadd.s32 1, %s806_s0  ;;  %s75_s27 = ssub.s32 %s810_s22, %s889_s25 }
  0x17   : > { %p88_p5 = scmp.ne.s32.totalorder %s806_s0, %s802_s21  ;;  %p76_p6 = scmp.eq.s32.totalorder %s75_s27, 0 }
  0x18   : > { %p89_p7 = scmp.eq.s32.totalorder %s885_s23, 1  ;;  %p94_p8 = scmp.ne.s32.totalorder %s802_s21, %s798_s20 }
  0x19   : > { %p95_p9 = scmp.eq.s32.totalorder %s481_s24, 1  ;;  %p482_p12 = scmp.ge.s32.totalorder %s810_s22, 1 }
  0x1a   : > { %s900_s28 = scalar_select %p76_p6, %s806_s0, %s78_s26  }
  0x1b   : > { %p902_p10 = por %p89_p7, %p88_p5  ;;  %p906_p11 = por %p95_p9, %p94_p8 }
  0x1c   : > { %1056 = sst [smem:[#allocation21_spill]] %s900_s28  ;;  %p102_p13 = scmp.lt.s32.totalorder %s810_s22, 3 }
  0x1d   : > { %s1058_s30 = scalar_select %p906_p11, 1, 0 }
  0x1e   : > { %p578_p1 = scmp.eq.s32.totalorder %s885_s23, 0  ;;  %p914_p2 = pnand %p482_p12, %p102_p13 }
  0x1f   : > { %s825_s6 = smov [#allocation6]  }
  0x20   : > { %s114_s7 = sshll.u32 %s825_s6, 4  ;;  %p570_p3 = pneg %p914_p2  ;;  %s115_s7 = int_to_ptr.vmem [resolvable:$true] %s114_s7 }
  0x21   : > { %s671_s8 = scalar_lea.vmem %s115_s7, 2048  ;;  %p679_p9 = scmp.lt.s32.totalorder %s115_s7, %s115_s7 }
  0x22   : > { %p571_p4 = pnand %p578_p1, %p570_p3  ;;  %p672_p6 = scmp.ne.s32.totalorder %s115_s7, %s671_s8 }
  0x23   : > { %p680_p0 = scmp.lt.s32.totalorder %s671_s8, %s671_s8 }
  0x24   : > { %p662_p5 = pneg %p571_p4 }
  0x25   : > { %p681_p11 = por %p680_p0, %p679_p9 }
  0x26   : > { %p674_p7 = pnand %p672_p6, %p662_p5 }
  0x28   : > { %p675_p8 = pneg %p674_p7 }
  0x2a   : > { %p682_p12 = pnand %p681_p11, %p675_p8 }
  0x2c   : > { %685 = shalt.err (!%p682_p12)
}
  0x2d   : > { %s826_s9 = smov 128   ;;  %s827_s10 = smov 8  }
  0x2e   : > { %s1060_s3 = sld [smem:[#allocation23_spill]] }
  0x30   : > { %137 = sbr.rel (%p914_p2) target bundleno = 500 (0x1f4), region = 28 }
  0x34   : > { %573 = dma.hbm_to_vmem [thread:$0]  (!%p571_p4), %s1060_s3, 2048, %s115_s7, [#allocation7], %s826_s9, %s826_s9, %s827_s10  }
  0x35   : > { %787 = dma.done.wait (%p578_p1), [#allocation7], 2048  }
  0x36   : > { %789 = vsyncadd (%p578_p1), [#allocation7], 4294965248  ;;  %s1051_s13 = sand.u32 1, %s802_s21   ;;  %p158_p11 = scmp.lt.s32.totalorder %s885_s23, 1 }
  0x37   : > { %s935_s14 = sshll.u32 %s1051_s13, 3  ;;  %s1061_s1 = sld [smem:[#allocation22_spill]] }
  0x38   : > { %s159_s15 = scalar_select %p158_p11, %s885_s23, 1 }
  0x39   : > { %p1062_p13 = scmp.ne.s32.totalorder %s885_s23, 0 }
  0x3a   : > { %s488_s16 = sshll.u32 %s159_s15, 3  ;;  %s946_s26 = smov (!%p1062_p13), 0  }
  0x3b   : > { %165 = sbr.rel (%p1062_p13) target bundleno = 99 (0x63), region = 36 }
  0x3d   : > { %s941_s19 = scalar_lea.vmem %s1061_s1, %s488_s16 }
  0x40 LB: >> { %s172_s27 = sld [smem:[#allocation5 + %s814_s26]]  ;;  %s175_s5 = scalar_lea.vmem [#allocation2], %s814_s26  ;;  %s814_s26 = sphi %s946_s26, %s171_s26  }
  0x41   : >> { %s183_s6 = sshll.u32 %s175_s5, 4  ;;  %s688_s16 = scalar_lea.hbm %s1048_s2, 512  ;;  %s184_s6 = int_to_ptr.vmem [resolvable:$true] %s183_s6 }
  0x46   : >> { %s490_s7 = sshll.u32 %s172_s27, 4 }
  0x47   : >> { %s174_s10 = scalar_lea.hbm %s1048_s2, %s490_s7 }
  0x48   : >> { %s686_s11 = scalar_lea.hbm %s174_s10, 16  ;;  %p689_p1 = scmp.lt.s32.totalorder %s174_s10, %s1048_s2 }
  0x49   : >> { %p687_p0 = scmp.ne.s32.totalorder %s174_s10, %s686_s11  ;;  %p690_p2 = scmp.lt.s32.totalorder %s688_s16, %s686_s11 }
  0x4b   : >> { %p691_p3 = por %p690_p2, %p689_p1 }
  0x4d   : >> { %p692_p4 = pnand %p691_p3, %p687_p0 }
  0x4f   : >> { %695 = shalt.err (!%p692_p4)  }
  0x50   : >> { %s696_s5 = scalar_lea.vmem %s184_s6, 16  ;;  %s828_s27 = smov [#allocation2]  }
  0x51   : >> { %p697_p5 = scmp.ne.s32.totalorder %s184_s6, %s696_s5  ;;  %s698_s13 = sshll.u32 %s828_s27, 4  ;;  %s699_s13 = int_to_ptr.vmem [resolvable:$false] %s698_s13 }
  0x52   : >> { %s700_s7 = scalar_lea.vmem %s699_s13, 256  ;;  %p701_p6 = scmp.lt.s32.totalorder %s184_s6, %s699_s13 }
  0x53   : >> { %p702_p7 = scmp.lt.s32.totalorder %s700_s7, %s696_s5 }
  0x55   : >> { %p703_p8 = por %p702_p7, %p701_p6 }
  0x57   : >> { %p704_p9 = pnand %p703_p8, %p697_p5 }
  0x59   : >> { %707 = shalt.err (!%p704_p9)  }
  0x5a   : >> { %186 = dma.hbm_to_vmem [thread:$0]  %s174_s10, 16, %s184_s6, [#allocation3] }
  0x5b   : >> { %s171_s26 = sadd.s32 1, %s814_s26  }
  0x5c   : >> { %p168_p12 = scmp.ge.s32.totalorder %s171_s26, 8  }
  0x5e   : > { %170 = sbr.rel (!%p168_p12) target bundleno = 64 (0x40), region = 113 }
  0x63 PF: > { %s187_s8 = sadd.s32 1, %s885_s23 }
  0x64   : > { %p491_p11 = scmp.ge.s32.totalorder %s187_s8, 2 }
  0x65   : > { %p192_p13 = scmp.lt.s32.totalorder (!%p491_p11), %s187_s8, 0  ;;  %s193_s9 = ssub.s32 (!%p491_p11), 0, %s187_s8 }
  0x66   : > { %191 = sbr.rel (%p491_p11) target bundleno = 147 (0x93), region = 51  ;;  %s492_s13 = smin.u32 (!%p491_p11), %s193_s9, %s187_s8 }
  0x67   : > { %s510_s11 = sshll.u32 (!%p491_p11), %s885_s23, 3  ;;  %s195_s12 = sand.u32 (!%p491_p11), 1, %s492_s13  }
  0x68   : > { %s967_s15 = sadd.s32 (!%p491_p11), 8, %s510_s11  ;;  %s196_s6 = ssub.s32 (!%p491_p11), 0, %s195_s12 }
  0x69   : > { %s971_s26 = smov (!%p491_p11), 0  }
  0x6b   : > { %s1073_s6 = smov (!%p192_p13, %s196_s6), %s195_s12 }
  0x6c   : > { %p494_p0 = scmp.lt.s32.totalorder %s1073_s6, 0  ;;  %s202_s10 = sadd.s32 2, %s1073_s6 }
  0x6e   : > { %s1075_s10 = smov (!%p494_p0, %s202_s10), %s1073_s6 }
  0x6f LB: >> { %s497_s16 = sshll.u32 %s1075_s10, 3  ;;  %s211_s17 = sadd.s32 %s818_s26, %s967_s15  ;;  %s818_s26 = sphi %s971_s26, %s210_s26  }
  0x70   : >> { %s216_s18 = sadd.s32 %s818_s26, %s497_s16  ;;  %s212_s5 = sld [smem:[#allocation5 + %s211_s17]] }
  0x71   : >> { %s217_s27 = scalar_lea.vmem [#allocation2], %s216_s18  ;;  %s218_s12 = scalar_lea.sflag [#allocation3], %s1075_s10 }
  0x72   : >> { %s226_s7 = sshll.u32 %s217_s27, 4  ;;  %s710_s3 = scalar_lea.hbm %s1048_s2, 512  ;;  %s227_s7 = int_to_ptr.vmem [resolvable:$true] %s226_s7 }
  0x76   : >> { %s496_s8 = sshll.u32 %s212_s5, 4 }
  0x77   : >> { %s214_s11 = scalar_lea.hbm %s1048_s2, %s496_s8 }
  0x78   : >> { %s708_s6 = scalar_lea.hbm %s214_s11, 16  ;;  %p711_p2 = scmp.lt.s32.totalorder %s214_s11, %s1048_s2 }
  0x79   : >> { %p709_p1 = scmp.ne.s32.totalorder %s214_s11, %s708_s6  ;;  %p712_p3 = scmp.lt.s32.totalorder %s710_s3, %s708_s6 }
  0x7b   : >> { %p713_p4 = por %p712_p3, %p711_p2 }
  0x7d   : >> { %p714_p5 = pnand %p713_p4, %p709_p1 }
  0x7f   : >> { %717 = shalt.err (!%p714_p5)  }
  0x80   : >> { %s718_s16 = scalar_lea.vmem %s227_s7, 16  ;;  %s829_s17 = smov [#allocation2]  }
  0x81   : >> { %p719_p6 = scmp.ne.s32.totalorder %s227_s7, %s718_s16  ;;  %s720_s18 = sshll.u32 %s829_s17, 4  ;;  %s721_s18 = int_to_ptr.vmem [resolvable:$false] %s720_s18 }
  0x82   : >> { %s722_s5 = scalar_lea.vmem %s721_s18, 256  ;;  %p723_p7 = scmp.lt.s32.totalorder %s227_s7, %s721_s18 }
  0x83   : >> { %p724_p8 = scmp.lt.s32.totalorder %s722_s5, %s718_s16 }
  0x85   : >> { %p725_p9 = por %p724_p8, %p723_p7 }
  0x87   : >> { %p726_p12 = pnand %p725_p9, %p719_p6 }
  0x89   : >> { %729 = shalt.err (!%p726_p12)  }
  0x8a   : >> { %229 = dma.hbm_to_vmem [thread:$0]  %s214_s11, 16, %s227_s7, %s218_s12 }
  0x8b   : >> { %s210_s26 = sadd.s32 1, %s818_s26  }
  0x8c   : >> { %p207_p11 = scmp.ge.s32.totalorder %s210_s26, 8  }
  0x8e   : > { %209 = sbr.rel (!%p207_p11) target bundleno = 111 (0x6f), region = 124 }
  0x93 PF: > { %p230_p13 = scmp.lt.s32.totalorder %s885_s23, 0  ;;  %s231_s1 = ssub.s32 0, %s885_s23 }
  0x94   : > { %s498_s3 = smin.u32 %s885_s23, %s231_s1  ;;  %s820_s27 = smov 0  }
  0x95   : > { %s233_s0 = sand.u32 1, %s498_s3  }
  0x96   : > { %s234_s28 = ssub.s32 0, %s233_s0 }
  0x97   : > { %s1077_s28 = smov (!%p230_p13, %s234_s28), %s233_s0 }
  0x98   : > { %p500_p0 = scmp.lt.s32.totalorder %s1077_s28, 0  ;;  %s240_s24 = sadd.s32 2, %s1077_s28 }
  0x9a   : > { %s1079_s24 = smov (!%p500_p0, %s240_s24), %s1077_s28 }
  0x9b LB: >> { %s248_s26 = scalar_lea.sflag [#allocation3], %s1079_s24  ;;  %s822_s27 = sphi %s820_s27, %s247_s27  }
  0x9c   : >> { %790 = dma.done.wait %s248_s26, 16 }
  0x9d   : >> { %791 = vsyncadd %s248_s26, 4294967280  ;;  %s247_s27 = sadd.s32 1, %s822_s27  }
  0x9e   : >> { %p244_p1 = scmp.ge.s32.totalorder %s247_s27, 8  }
  0x9f   : > { %v253_v0 = vld [vmem:[%s941_s19] sm:$0xff] (%p244_p1)  ;;  %v280_v1 = vld [vmem:[#allocation6 + $0x78] sm:$0xff] (%p244_p1)  ;;  %v830_v2 = vmov (%p244_p1), 0   ;;  %v831_v3 = vmov (%p244_p1), 0.0   ;;  %v278_v5 = vld [vmem:[#allocation6 + $0x68] sm:$0xff] (%p244_p1)  ;;  %vm832_vm0 = vmmov (%p244_p1), 0   ;;  %v251_v20 = vlaneseq (%p244_p1) }
  0xa0   : > { %246 = sbr.rel (!%p244_p1) target bundleno = 155 (0x9b), region = 135  ;;  %646 = vset.pattern.permute.xlu0 (%p244_p1), %v830_v2  ;;  %529 = vmatprep.subr.mxu0 (%p244_p1), %v831_v3  ;;  %v279_v4 = vld [vmem:[#allocation6 + $0x70] sm:$0xff] (%p244_p1)  ;;  %v277_v6 = vld [vmem:[#allocation6 + $0x60] sm:$0xff] (%p244_p1)  ;;  %v833_v7 = vmov (%p244_p1), 1   ;;  %v276_v8 = vld [vmem:[#allocation6 + $0x58] sm:$0xff] (%p244_p1)  ;;  %v834_v24 = vmov (%p244_p1), 1.0  }
  0xa1   : > { %255 = vperm.xlu0 (%p244_p1), %646, %v253_v0   ;;  %530 = vmatpush3.msra.mxu0 (%p244_p1), %v280_v1  ;;  %v275_v9 = vld [vmem:[#allocation6 + $0x50] sm:$0xff] (%p244_p1)  ;;  %v274_v10 = vld [vmem:[#allocation6 + $0x48] sm:$0xff] (%p244_p1)  ;;  %v273_v11 = vld [vmem:[#allocation6 + $0x40] sm:$0xff] (%p244_p1)  ;;  %v252_v22 = vand.u32 (%p244_p1), 127, %v251_v20  ;;  %s503_s19 = sshll.u32 (%p244_p1), %s1079_s24, 3  ;;  %s505_s10 = sshll.u32 (%p244_p1), %s885_s23, 7 }
  0xa2   : > { %531 = vmatprep.subr.mxu0 (%p244_p1), %v831_v3  ;;  %561 = vmatprep.mubr.msk.f32.mxu0 (%p244_p1), %vm832_vm0, %v831_v3  ;;  %v272_v12 = vld [vmem:[#allocation6 + $0x38] sm:$0xff] (%p244_p1)  ;;  %v271_v13 = vld [vmem:[#allocation6 + $0x30] sm:$0xff] (%p244_p1)  ;;  %v270_v14 = vld [vmem:[#allocation6 + $0x28] sm:$0xff] (%p244_p1)  ;;  %s352_s15 = scalar_lea.vmem (%p244_p1), [#allocation2], %s503_s19  ;;  %s1063_s7 = scalar_lea.vmem (%p244_p1), [#allocation9], %s935_s14 }
  0xa3   : > { %532 = vmatpush3.msra.mxu0 (%p244_p1), %v279_v4  ;;  %v269_v15 = vld [vmem:[#allocation6 + $0x20] sm:$0xff] (%p244_p1)  ;;  %v268_v16 = vld [vmem:[#allocation6 + $0x18] sm:$0xff] (%p244_p1)  ;;  %v267_v17 = vld [vmem:[#allocation6 + $0x10] sm:$0xff] (%p244_p1)  ;;  %s370_s8 = sshll.u32 (%p244_p1), %s1063_s7, 4  ;;  %s1007_s11 = scalar_lea.hbm (%p244_p1), %s1050_s4, %s505_s10  ;;  %s371_s8 = int_to_ptr.vmem [resolvable:$true] %s370_s8 }
  0xa4   : > { %533 = vmatprep.subr.mxu0 (%p244_p1), %v831_v3  ;;  %v266_v18 = vld [vmem:[#allocation6 + $0x8] sm:$0xff] (%p244_p1)  ;;  %v265_v19 = vld [vmem:[#allocation6] sm:$0xff] (%p244_p1)  ;;  %v353_v25 = vld [vmem:[%s352_s15] sm:$0xff] (%p244_p1)  ;;  %s1064_s12 = smov (%p244_p1), %s1063_s7  ;;  %s1065_s6 = sand.u32 (%p244_p1), 1, %s802_s21  }
  0xa5   : > { %647 = vset.pattern.permute.xlu0 %v833_v7  ;;  %534 = vmatpush3.msra.mxu0 %v278_v5  ;;  %s357_s16 = scalar_lea.sflag [#allocation8], %s1065_s6  ;;  %s730_s17 = scalar_lea.vmem %s371_s8, 128 }
  0xa6   : > { %259 = vperm.xlu0 %647, %v253_v0   ;;  %535 = vmatprep.subr.mxu0 %v831_v3  ;;  %p731_p2 = scmp.ne.s32.totalorder %s371_s8, %s730_s17  ;;  %s835_s23 = smov [#allocation9]  }
  0xa7   : > { %536 = vmatpush3.msra.mxu0 %v277_v6  ;;  %s734_s18 = sshll.u32 %s835_s23, 4  ;;  %s735_s18 = int_to_ptr.vmem [resolvable:$false] %s734_s18 }
  0xa8   : > { %537 = vmatprep.subr.mxu0 %v831_v3  ;;  %p732_p3 = pnand %p731_p2, %p902_p10  ;;  %s736_s5 = scalar_lea.vmem %s735_s18, 256 }
  0xa9   : > { %538 = vmatpush3.msra.mxu0 %v276_v8  ;;  %p737_p5 = scmp.lt.s32.totalorder %s371_s8, %s735_s18  ;;  %p738_p6 = scmp.lt.s32.totalorder %s736_s5, %s730_s17 }
  0xaa   : > { %539 = vmatprep.subr.mxu0 %v831_v3  ;;  %p733_p4 = pneg %p732_p3 }
  0xab   : > { %540 = vmatpush3.msra.mxu0 %v275_v9  ;;  %p739_p7 = por %p738_p6, %p737_p5 }
  0xac   : > { %541 = vmatprep.subr.mxu0 %v831_v3 }
  0xad   : > { %542 = vmatpush3.msra.mxu0 %v274_v10  ;;  %p740_p8 = pnand %p739_p7, %p733_p4 }
  0xae   : > { %543 = vmatprep.subr.mxu0 %v831_v3 }
  0xaf   : > { %544 = vmatpush3.msra.mxu0 %v273_v11 }
  0xb0   : > { %545 = vmatprep.subr.mxu0 %v831_v3 }
  0xb1   : > { %546 = vmatpush3.msra.mxu0 %v272_v12 }
  0xb2   : > { %547 = vmatprep.subr.mxu0 %v831_v3 }
  0xb3   : > { %548 = vmatpush3.msra.mxu0 %v271_v13 }
  0xb4   : > { %549 = vmatprep.subr.mxu0 %v831_v3 }
  0xb5   : > { %550 = vmatpush3.msra.mxu0 %v270_v14 }
  0xb6   : > { %551 = vmatprep.subr.mxu0 %v831_v3 }
  0xb7   : > { %552 = vmatpush3.msra.mxu0 %v269_v15 }
  0xb8   : > { %553 = vmatprep.subr.mxu0 %v831_v3 }
  0xb9   : > { %554 = vmatpush3.msra.mxu0 %v268_v16 }
  0xba   : > { %555 = vmatprep.subr.mxu0 %v831_v3 }
  0xbb   : > { %556 = vmatpush3.msra.mxu0 %v267_v17 }
  0xbc   : > { %557 = vmatprep.subr.mxu0 %v831_v3 }
  0xbd   : > { %558 = vmatpush3.msra.mxu0 %v266_v18 }
  0xbe   : > { %559 = vmatprep.subr.mxu0 %v831_v3 }
  0xbf   : > { %560 = vmatpush3.msra.mxu0 %v265_v19 }
 0x11c   : > { %v256_v21 = vpop.permute.xlu0 %255 }
 0x11d   : > { %vm257_vm1 = vcmp.eq.s32.totalorder %v252_v22, %v256_v21 }
 0x121   : > { %v260_v23 = vpop.permute.xlu0 %259 }
 0x122   : > { %vm261_vm2 = vcmp.eq.s32.totalorder %v252_v22, %v260_v23 }
 0x123   : > { %vm262_vm3 = vmor %vm257_vm1, %vm261_vm2 }
 0x124   : > { %562 = vmatmul.mubr.msk.f32.vlgmr.msra.gmra.mxu0 %vm262_vm3, %v834_v24 }
 0x1e4   : > { %v347_v26 = vpop.f32.mrf.mxu0 }
 0x1e5   : > { %v354_v27 = vadd.f32 %v353_v25, %v347_v26 }
 0x1e6   : > { %v563_v28 = vpop.f32.mrf.mxu0 }
 0x1e7   : > { %355 = vst [vmem:[%s1064_s12] sm:$0xff] %v354_v27 }
 0x1e8   : > { %743 = shalt.err (!%p740_p8)
}
 0x1e9   : > { %s744_s14 = scalar_lea.hbm %s1007_s11, 128  ;;  %s748_s0 = scalar_lea.hbm %s1050_s4, 256 }
 0x1ea   : > { %p745_p9 = scmp.ne.s32.totalorder %s1007_s11, %s744_s14  ;;  %p749_p13 = scmp.lt.s32.totalorder %s1007_s11, %s1050_s4 }
 0x1eb   : > { %p750_p0 = scmp.lt.s32.totalorder %s748_s0, %s744_s14 }
 0x1ec   : > { %p746_p12 = pnand %p745_p9, %p902_p10 }
 0x1ed   : > { %p751_p1 = por %p750_p0, %p749_p13 }
 0x1ee   : > { %p747_p11 = pneg %p746_p12 }
 0x1f0   : > { %p752_p2 = pnand %p751_p1, %p747_p11 }
 0x1f2   : > { %755 = shalt.err (!%p752_p2)
}
 0x1f3   : > { %568 = dma.vmem_to_hbm [thread:$0]  (%p902_p10), %s371_s8, 128, %s1007_s11, %s357_s16  }
 0x1f4 PF: > { %p580_p3 = scmp.ge.s32.totalorder %s810_s22, 2  ;;  %s382_s27 = sand.u32 1, %s798_s20  }
 0x1f5   : > { %p1066_p4 = scmp.ne.s32.totalorder %s1058_s30, 0  ;;  %s383_s26 = scalar_lea.sflag [#allocation8], %s382_s27 }
 0x1f7   : > { %p575_p5 = pnand %p580_p3, %p1066_p4 }
 0x1f9   : > { %p576_p6 = pneg %p575_p5 }
 0x1fb   : > { %793 = dma.done.wait (%p576_p6), %s383_s26, 128  }
 0x1fc   : > { %795 = vsyncadd (%p576_p6), %s383_s26, 4294967168  ;;  %s1067_s19 = sld [smem:[#allocation20_spill]]  ;;  %p21_p7 = scmp.ge.s32.totalorder %s889_s25, 4  }
 0x1fd   : > { %s1068_s0 = sld [smem:[#allocation21_spill]]  ;;  %s1069_s20 = smov %s802_s21 }
 0x1fe   : > { %s1071_s22 = smov %s889_s25  ;;  %23 = sbr.rel (!%p21_p7) target bundleno = 20 (0x14), region = 146 }
 0x202   : > { %s1070_s21 = smov %s1067_s19 }
 0x203   :  { %388 = vsyncpa [#allocation7], 1 }
 0x204   :  { %390 = vsyncpa [#allocation7 + $0x1], 1 }
 0x205   :  { %391 = vsyncpa [#allocation8], 1 }
 0x206   :  { %393 = vsyncpa [#allocation8 + $0x1], 1 }
 0x207   :  { %394 = vsyncmov [#allocation3] }
 0x20a   :  { %s395_s22 = vpop.sfrf %394 }
 0x20b   :  { %p508_p10 = scmp.ne.s32.totalorder %s395_s22, 0 }
 0x20d   :  { %399 = shalt.err (%p508_p10)  }
 0x20e   :  { %401 = vsyncmov [#allocation3 + $0x1] }
 0x211   :  { %s402_s29 = vpop.sfrf %401 }
 0x212   :  { %p509_p8 = scmp.ne.s32.totalorder %s402_s29, 0 }
 0x214   :  { %406 = shalt.err (%p509_p8)  }

</bundles_post_ra>
